<compile_context>
chip_gen: v7x
topology: tpu7x:2x2x1
jax: 0.10.0
libtpu: 0.0.40
codegen_flags: <defaults>
</compile_context>

<pallas_src>
import functools
from math import sqrt

import jax
import jax.numpy as jnp
from jax import lax
from jax.experimental import pallas as pl
from jax.experimental.pallas import tpu as pltpu

_MASK_VALUE = -1e30  # finite "minus infinity": exp() underflows to 0, no NaNs


def _round_up(x, m):
    return (x + m - 1) // m * m


def _choose_tile(seq_len, block_size):
    """Sequence tile: multiple of 16 (bf16-sublane friendly), minimal padding."""
    block_size = max(16, (min(block_size, 512) // 16) * 16)
    if seq_len <= block_size:
        return _round_up(seq_len, 16)
    cands = [c for c in (512, 256, 128, 64, 32, 16) if c <= block_size]
    # smallest padded length first, then the largest tile achieving it
    return min(cands, key=lambda c: (_round_up(seq_len, c), -c))


def _vmem_limit(working_set_bytes):
    # 2x headroom, clamped to [32 MiB, 48 MiB] (safe under v7x's 64 MiB VMEM,
    # ample on v5e/v6e's 128 MiB).
    return int(min(max(2 * working_set_bytes, 32 << 20), 48 << 20))


# ---------------------------------------------------------------------------
# 1) Prologue: fused Q/K/V projections (x @ W), q pre-scaled by 1/sqrt(d).
# ---------------------------------------------------------------------------
def _project_kernel(xq_ref, xk_ref, xv_ref, wq_ref, wk_ref, wv_ref,
                    q_ref, k_ref, v_ref, *, scale):
    # bf16 MXU operands, f32 accumulation; results stored in bf16.
    xq = xq_ref[0].astype(jnp.bfloat16)
    xk = xk_ref[0].astype(jnp.bfloat16)
    xv = xv_ref[0].astype(jnp.bfloat16)
    q = jnp.dot(xq, wq_ref[...], preferred_element_type=jnp.float32)
    q_ref[0] = (q * scale).astype(q_ref.dtype)          # fold 1/sqrt(d) into q
    k_ref[0] = jnp.dot(xk, wk_ref[...],
                       preferred_element_type=jnp.float32).astype(k_ref.dtype)
    v_ref[0] = jnp.dot(xv, wv_ref[...],
                       preferred_element_type=jnp.float32).astype(v_ref.dtype)


def _project_qkv(xq, xk, xv, wq, wk, wv, *, head_dim, tile):
    B, S_pad, E = xq.shape
    Hp = wq.shape[1]

    x_spec = pl.BlockSpec((1, tile, E), lambda b, i: (b, i, 0))
    w_spec = pl.BlockSpec((E, Hp), lambda b, i: (0, 0))   # constant -> DMA'd once
    o_spec = pl.BlockSpec((1, tile, Hp), lambda b, i: (b, i, 0))
    out_sds = jax.ShapeDtypeStruct((B, S_pad, Hp), jnp.bfloat16)

    # double-buffered x tiles + bf16 out tiles + bf16 weights
    ws = 2 * (3 * tile * E * 4 + 3 * tile * Hp * 2) + 2 * 3 * E * Hp * 2

    return pl.pallas_call(
        functools.partial(_project_kernel, scale=1.0 / sqrt(head_dim)),
        out_shape=(out_sds, out_sds, out_sds),
        grid_spec=pltpu.PrefetchScalarGridSpec(
            num_scalar_prefetch=0,
            grid=(B, S_pad // tile),
            in_specs=[x_spec, x_spec, x_spec, w_spec, w_spec, w_spec],
            out_specs=[o_spec, o_spec, o_spec]),
        compiler_params=pltpu.CompilerParams(
            dimension_semantics=("parallel", "parallel"),
            vmem_limit_bytes=_vmem_limit(ws)),
    )(xq, xk, xv, wq, wk, wv)


# ---------------------------------------------------------------------------
# 2) Flash attention over the projected (bf16, pre-scaled) q/k/v.
# ---------------------------------------------------------------------------
def _flash_kernel(q_ref, k_ref, v_ref, o_ref, m_ref, l_ref, acc_ref, *,
                  seq_len, tile, is_causal, mask_kv_pad):
    qi = pl.program_id(1)
    kj = pl.program_id(2)
    nk = pl.num_programs(2)

    # ---- init once per (batch, q-tile), at the start of the kv sweep --------
    @pl.when(kj == 0)
    def _init():
        m_ref[...] = jnp.full(m_ref.shape, _MASK_VALUE, jnp.float32)
        l_ref[...] = jnp.zeros(l_ref.shape, jnp.float32)
        acc_ref[...] = jnp.zeros(acc_ref.shape, jnp.float32)

    # ---- one kv tile: online softmax update (apply_* are Python bools) ------
    def _update(apply_causal, apply_kv_pad):
        # Contract the head dim of q and k directly (no explicit k.T / XLU).
        s = lax.dot_general(q_ref[0], k_ref[0],
                            dimension_numbers=(((1,), (1,)), ((), ())),
                            preferred_element_type=jnp.float32)   # (tq, tk)

        if apply_causal or apply_kv_pad:
            kv_pos = kj * tile + lax.broadcasted_iota(jnp.int32, s.shape, 1)
            valid = None
            if apply_kv_pad:                       # padded kv positions (last tile)
                valid = kv_pos < seq_len
            if apply_causal:                       # only the diagonal tile
                q_pos = qi * tile + lax.broadcasted_iota(jnp.int32, s.shape, 0)
                causal_ok = kv_pos <= q_pos
                valid = causal_ok if valid is None else jnp.logical_and(
                    valid, causal_ok)
            s = jnp.where(valid, s, _MASK_VALUE)

        m_prev = m_ref[...]
        m_new = jnp.maximum(m_prev, jnp.max(s, axis=-1, keepdims=True))
        alpha = jnp.exp(m_prev - m_new)
        # NOTE: on v6e/v7x exp could be computed in bf16 (bf16 EUP) since p is
        # cast to bf16 for the PV matmul anyway; kept in f32 for v5e safety.
        p = jnp.exp(s - m_new)
        l_ref[...] = alpha * l_ref[...] + jnp.sum(p, axis=-1, keepdims=True)
        acc_ref[...] = alpha * acc_ref[...] + jnp.dot(
            p.astype(jnp.bfloat16), v_ref[0],
            preferred_element_type=jnp.float32)
        m_ref[...] = m_new

    if is_causal:
        # kj > qi: fully skipped (compute here, DMA via the clamped index_map).
        pl.when(kj == qi)(lambda: _update(True, False))   # diagonal tile
        pl.when(kj < qi)(lambda: _update(False, False))   # interior: no mask
    else:
        if mask_kv_pad:
            pl.when(kj == nk - 1)(lambda: _update(False, True))
            pl.when(kj < nk - 1)(lambda: _update(False, False))
        else:
            _update(False, False)

    # ---- finalize after the last *executed* kv tile --------------------------
    last_kj = qi if is_causal else nk - 1
    @pl.when(kj == last_kj)
    def _finalize():
        o_ref[0] = (acc_ref[...] / l_ref[...]).astype(o_ref.dtype)  # exact recip


def attention_head(querys, keys, values, wq, wk, wv, *, is_causal=False,
                   block_size=512):
    """Pallas implementation of AttentionHead.forward.

    querys/keys/values : (B, S, E) float32
    wq/wk/wv           : (E, H)    float32 (transposed PyTorch Linear weight)
    returns            : (B, S, H) float32
    """
    B, S, E = querys.shape
    H = wq.shape[1]

    Hp = _round_up(H, 128)            # lane-dense head dim (un-padded on return)
    t = _choose_tile(S, block_size)   # sequence tile (both tq and tk)
    S_pad = _round_up(S, t)

    if S_pad != S:
        pad = ((0, 0), (0, S_pad - S), (0, 0))
        querys = jnp.pad(querys, pad)
        keys = jnp.pad(keys, pad)
        values = jnp.pad(values, pad)
    if Hp != H:
        wpad = ((0, 0), (0, Hp - H))
        wq = jnp.pad(wq, wpad)
        wk = jnp.pad(wk, wpad)
        wv = jnp.pad(wv, wpad)
    # bf16 weights: the MXU runs at full rate only for bf16 operands.
    wq = wq.astype(jnp.bfloat16)
    wk = wk.astype(jnp.bfloat16)
    wv = wv.astype(jnp.bfloat16)

    # 1) project Q/K/V once (removes the nq-fold K/V recompute in the kv sweep).
    q_p, k_p, v_p = _project_qkv(querys, keys, values, wq, wk, wv,
                                 head_dim=H, tile=t)

    # 2) flash attention over the projected tensors.
    nq = S_pad // t
    nk = S_pad // t

    q_spec = pl.BlockSpec((1, t, Hp), lambda b, i, j: (b, i, 0))
    if is_causal:
        # Clamp: above-diagonal kv tiles map to the already-fetched diagonal
        # block, so Pallas elides their HBM DMA entirely.
        kv_spec = pl.BlockSpec((1, t, Hp),
                               lambda b, i, j: (b, jnp.minimum(i, j), 0))
    else:
        kv_spec = pl.BlockSpec((1, t, Hp), lambda b, i, j: (b, j, 0))
    out_spec = pl.BlockSpec((1, t, Hp), lambda b, i, j: (b, i, 0))

    kernel = functools.partial(
        _flash_kernel, seq_len=S, tile=t,
        is_causal=is_causal, mask_kv_pad=(S_pad != S))

    ws = 2 * (3 * t * Hp * 2 + t * Hp * 4) + (t * Hp * 4 + 2 * t * 4)

    out = pl.pallas_call(
        kernel,
        out_shape=jax.ShapeDtypeStruct((B, S_pad, Hp), jnp.float32),
        grid_spec=pltpu.PrefetchScalarGridSpec(
            num_scalar_prefetch=0,
            grid=(B, nq, nk),
            in_specs=[q_spec, kv_spec, kv_spec],
            out_specs=out_spec,
            scratch_shapes=[
                pltpu.VMEM((t, 1), jnp.float32),    # running row max
                pltpu.VMEM((t, 1), jnp.float32),    # running denominator
                pltpu.VMEM((t, Hp), jnp.float32),   # output accumulator
            ]),
        compiler_params=pltpu.CompilerParams(
            dimension_semantics=("parallel", "parallel", "arbitrary"),
            vmem_limit_bytes=_vmem_limit(ws)),
    )(q_p, k_p, v_p)

    if S_pad != S or Hp != H:
        out = out[:, :S, :H]
    return out


def attention_head_reference(querys, keys, values, wq, wk, wv, *,
                             is_causal=False):
    """Pure-JAX reference mirroring the PyTorch module."""
    q = querys @ wq
    k = keys @ wk
    v = values @ wv
    dim_k = q.shape[-1]
    scores = jnp.einsum("bqd,bkd->bqk", q, k) / sqrt(dim_k)
    if is_causal:
        s = scores.shape[-1]
        mask = jnp.tril(jnp.ones((s, s)))[None, :, :]
        scores = jnp.where(mask == 0, -jnp.inf, scores)
    weights = jax.nn.softmax(scores, axis=-1)
    return jnp.einsum("bqk,bkd->bqd", weights, v)


if __name__ == "__main__":
    key = jax.random.PRNGKey(0)
    kq, kk, kv_, kwq, kwk, kwv = jax.random.split(key, 6)

    ok = True
    # (B, S, E, H, block_size):
    #   case 1: base path (seq padded 8 -> 16, head dim padded 16 -> 128)
    #   case 2: kv-padding mask path (S=12 -> 16)
    #   case 3: multi-tile online softmax + causal tile skipping (3x3 kv grid)
    cases = ((2, 8, 32, 16, 512), (2, 12, 32, 16, 512), (2, 40, 32, 16, 16))
    for (B, S, E, H, bs) in cases:
        querys = jax.random.normal(kq, (B, S, E), dtype=jnp.float32)
        keys = jax.random.normal(kk, (B, S, E), dtype=jnp.float32)
        values = jax.random.normal(kv_, (B, S, E), dtype=jnp.float32)

        # nn.Linear(E, H, bias=False) weight is (H, E); we store its transpose
        # (E, H) so the kernels compute x @ W (== x @ W_torch.T).
        scale = 1.0 / sqrt(E)
        wq = jax.random.uniform(kwq, (E, H), minval=-scale, maxval=scale,
                                dtype=jnp.float32)
        wk = jax.random.uniform(kwk, (E, H), minval=-scale, maxval=scale,
                                dtype=jnp.float32)
        wv = jax.random.uniform(kwv, (E, H), minval=-scale, maxval=scale,
                                dtype=jnp.float32)

        for is_causal in (False, True):
            out = attention_head(querys, keys, values, wq, wk, wv,
                                 is_causal=is_causal, block_size=bs)
            out = jax.block_until_ready(out)
            ref = attention_head_reference(querys, keys, values, wq, wk, wv,
                                           is_causal=is_causal)
            # bf16 MXU operands (f32 accumulation) vs a pure-f32 reference.
            case_ok = bool(jnp.allclose(out, ref, atol=2e-2, rtol=2e-2))
            if not case_ok:
                err = float(jnp.max(jnp.abs(out - ref)))
                print(f"mismatch B={B} S={S} causal={is_causal} "
                      f"max_abs_err={err:.3e}")
            ok = ok and case_ok

    print("KERNEL_OK" if ok else "KERNEL_MISMATCH")
</pallas_src>

<mosaic_0001>
module attributes {stable_mosaic.version = 11 : i64} {
  func.func @_project_kernel(%arg0: i32, %arg1: i32, %arg2: memref<1x16x32xf32, #tpu.memory_space<vmem>>, %arg3: memref<1x16x32xf32, #tpu.memory_space<vmem>>, %arg4: memref<1x16x32xf32, #tpu.memory_space<vmem>>, %arg5: memref<32x128xbf16, #tpu.memory_space<vmem>>, %arg6: memref<32x128xbf16, #tpu.memory_space<vmem>>, %arg7: memref<32x128xbf16, #tpu.memory_space<vmem>>, %arg8: memref<1x16x128xbf16, #tpu.memory_space<vmem>>, %arg9: memref<1x16x128xbf16, #tpu.memory_space<vmem>>, %arg10: memref<1x16x128xbf16, #tpu.memory_space<vmem>>) attributes {dimension_semantics = [#tpu.dimension_semantics<parallel>, #tpu.dimension_semantics<parallel>], iteration_bounds = array<i64: 2, 1>, scalar_prefetch = 0 : i64, scratch_operands = 0 : i64, tpu.core_type = #tpu.core_type<tc>, window_params = [{transform_indices = @transform_0, window_bounds = array<i64: 1, 16, 32>}, {transform_indices = @transform_1, window_bounds = array<i64: 1, 16, 32>}, {transform_indices = @transform_2, window_bounds = array<i64: 1, 16, 32>}, {pipeline_mode = #tpu.pipeline_mode<synchronous>, transform_indices = @transform_3, window_bounds = array<i64: 32, 128>}, {pipeline_mode = #tpu.pipeline_mode<synchronous>, transform_indices = @transform_4, window_bounds = array<i64: 32, 128>}, {pipeline_mode = #tpu.pipeline_mode<synchronous>, transform_indices = @transform_5, window_bounds = array<i64: 32, 128>}, {transform_indices = @transform_6, window_bounds = array<i64: 1, 16, 128>}, {transform_indices = @transform_7, window_bounds = array<i64: 1, 16, 128>}, {transform_indices = @transform_8, window_bounds = array<i64: 1, 16, 128>}]} {
    %c0 = arith.constant 0 : index
    %c0_0 = arith.constant 0 : index
    %c0_1 = arith.constant 0 : index
    %0 = vector.load %arg2[%c0, %c0_0, %c0_1] : memref<1x16x32xf32, #tpu.memory_space<vmem>>, vector<1x16x32xf32>
    %1 = vector.shape_cast %0 : vector<1x16x32xf32> to vector<16x32xf32>
    %2 = arith.truncf %1 : vector<16x32xf32> to vector<16x32xbf16>
    %c0_2 = arith.constant 0 : index
    %c0_3 = arith.constant 0 : index
    %c0_4 = arith.constant 0 : index
    %3 = vector.load %arg3[%c0_2, %c0_3, %c0_4] : memref<1x16x32xf32, #tpu.memory_space<vmem>>, vector<1x16x32xf32>
    %4 = vector.shape_cast %3 : vector<1x16x32xf32> to vector<16x32xf32>
    %5 = arith.truncf %4 : vector<16x32xf32> to vector<16x32xbf16>
    %c0_5 = arith.constant 0 : index
    %c0_6 = arith.constant 0 : index
    %c0_7 = arith.constant 0 : index
    %6 = vector.load %arg4[%c0_5, %c0_6, %c0_7] : memref<1x16x32xf32, #tpu.memory_space<vmem>>, vector<1x16x32xf32>
    %7 = vector.shape_cast %6 : vector<1x16x32xf32> to vector<16x32xf32>
    %8 = arith.truncf %7 : vector<16x32xf32> to vector<16x32xbf16>
    %c0_8 = arith.constant 0 : index
    %c0_9 = arith.constant 0 : index
    %9 = vector.load %arg5[%c0_8, %c0_9] : memref<32x128xbf16, #tpu.memory_space<vmem>>, vector<32x128xbf16>
    %cst = arith.constant dense<0.000000e+00> : vector<16x128xf32>
    %10 = tpu.matmul %2, %9, %cst {dimension_numbers = #tpu.dot_dimension_numbers<[1], [0], [0], [1], [0, 0, 1, 1], [], []>} : vector<16x32xbf16>, vector<32x128xbf16>, vector<16x128xf32> -> vector<16x128xf32>
    %cst_10 = arith.constant 2.500000e-01 : f32
    %11 = vector.broadcast %cst_10 : f32 to vector<16x128xf32>
    %12 = arith.mulf %10, %11 : vector<16x128xf32>
    %13 = arith.truncf %12 : vector<16x128xf32> to vector<16x128xbf16>
    %c0_11 = arith.constant 0 : index
    %c0_12 = arith.constant 0 : index
    %c0_13 = arith.constant 0 : index
    %14 = vector.load %arg8[%c0_11, %c0_12, %c0_13] : memref<1x16x128xbf16, #tpu.memory_space<vmem>>, vector<1x16x128xbf16>
    %15 = vector.shape_cast %14 : vector<1x16x128xbf16> to vector<16x128xbf16>
    %16 = vector.shape_cast %13 : vector<16x128xbf16> to vector<1x16x128xbf16>
    tpu.vector_store %arg8[%c0_11, %c0_12, %c0_13], %16 {strides = array<i32>} : memref<1x16x128xbf16, #tpu.memory_space<vmem>>, vector<1x16x128xbf16>,
    %c0_14 = arith.constant 0 : index
    %c0_15 = arith.constant 0 : index
    %17 = vector.load %arg6[%c0_14, %c0_15] : memref<32x128xbf16, #tpu.memory_space<vmem>>, vector<32x128xbf16>
    %cst_16 = arith.constant dense<0.000000e+00> : vector<16x128xf32>
    %18 = tpu.matmul %5, %17, %cst_16 {dimension_numbers = #tpu.dot_dimension_numbers<[1], [0], [0], [1], [0, 0, 1, 1], [], []>} : vector<16x32xbf16>, vector<32x128xbf16>, vector<16x128xf32> -> vector<16x128xf32>
    %19 = arith.truncf %18 : vector<16x128xf32> to vector<16x128xbf16>
    %c0_17 = arith.constant 0 : index
    %c0_18 = arith.constant 0 : index
    %c0_19 = arith.constant 0 : index
    %20 = vector.load %arg9[%c0_17, %c0_18, %c0_19] : memref<1x16x128xbf16, #tpu.memory_space<vmem>>, vector<1x16x128xbf16>
    %21 = vector.shape_cast %20 : vector<1x16x128xbf16> to vector<16x128xbf16>
    %22 = vector.shape_cast %19 : vector<16x128xbf16> to vector<1x16x128xbf16>
    tpu.vector_store %arg9[%c0_17, %c0_18, %c0_19], %22 {strides = array<i32>} : memref<1x16x128xbf16, #tpu.memory_space<vmem>>, vector<1x16x128xbf16>,
    %c0_20 = arith.constant 0 : index
    %c0_21 = arith.constant 0 : index
    %23 = vector.load %arg7[%c0_20, %c0_21] : memref<32x128xbf16, #tpu.memory_space<vmem>>, vector<32x128xbf16>
    %cst_22 = arith.constant dense<0.000000e+00> : vector<16x128xf32>
    %24 = tpu.matmul %8, %23, %cst_22 {dimension_numbers = #tpu.dot_dimension_numbers<[1], [0], [0], [1], [0, 0, 1, 1], [], []>} : vector<16x32xbf16>, vector<32x128xbf16>, vector<16x128xf32> -> vector<16x128xf32>
    %25 = arith.truncf %24 : vector<16x128xf32> to vector<16x128xbf16>
    %c0_23 = arith.constant 0 : index
    %c0_24 = arith.constant 0 : index
    %c0_25 = arith.constant 0 : index
    %26 = vector.load %arg10[%c0_23, %c0_24, %c0_25] : memref<1x16x128xbf16, #tpu.memory_space<vmem>>, vector<1x16x128xbf16>
    %27 = vector.shape_cast %26 : vector<1x16x128xbf16> to vector<16x128xbf16>
    %28 = vector.shape_cast %25 : vector<16x128xbf16> to vector<1x16x128xbf16>
    tpu.vector_store %arg10[%c0_23, %c0_24, %c0_25], %28 {strides = array<i32>} : memref<1x16x128xbf16, #tpu.memory_space<vmem>>, vector<1x16x128xbf16>,
    return
  }
  func.func @transform_0(%arg0: i32, %arg1: i32) -> (i32, i32, i32) {
    %c0_i32 = arith.constant 0 : i32
    %c0_i32_0 = arith.constant 0 : i32
    return %arg0, %arg1, %c0_i32 : i32, i32, i32
  }
  func.func @transform_1(%arg0: i32, %arg1: i32) -> (i32, i32, i32) {
    %c0_i32 = arith.constant 0 : i32
    %c0_i32_0 = arith.constant 0 : i32
    return %arg0, %arg1, %c0_i32 : i32, i32, i32
  }
  func.func @transform_2(%arg0: i32, %arg1: i32) -> (i32, i32, i32) {
    %c0_i32 = arith.constant 0 : i32
    %c0_i32_0 = arith.constant 0 : i32
    return %arg0, %arg1, %c0_i32 : i32, i32, i32
  }
  func.func @transform_3(%arg0: i32, %arg1: i32) -> (i32, i32) {
    %c0_i32 = arith.constant 0 : i32
    %c0_i32_0 = arith.constant 0 : i32
    %c0_i32_1 = arith.constant 0 : i32
    return %c0_i32, %c0_i32_0 : i32, i32
  }
  func.func @transform_4(%arg0: i32, %arg1: i32) -> (i32, i32) {
    %c0_i32 = arith.constant 0 : i32
    %c0_i32_0 = arith.constant 0 : i32
    %c0_i32_1 = arith.constant 0 : i32
    return %c0_i32, %c0_i32_0 : i32, i32
  }
  func.func @transform_5(%arg0: i32, %arg1: i32) -> (i32, i32) {
    %c0_i32 = arith.constant 0 : i32
    %c0_i32_0 = arith.constant 0 : i32
    %c0_i32_1 = arith.constant 0 : i32
    return %c0_i32, %c0_i32_0 : i32, i32
  }
  func.func @transform_6(%arg0: i32, %arg1: i32) -> (i32, i32, i32) {
    %c0_i32 = arith.constant 0 : i32
    %c0_i32_0 = arith.constant 0 : i32
    return %arg0, %arg1, %c0_i32 : i32, i32, i32
  }
  func.func @transform_7(%arg0: i32, %arg1: i32) -> (i32, i32, i32) {
    %c0_i32 = arith.constant 0 : i32
    %c0_i32_0 = arith.constant 0 : i32
    return %arg0, %arg1, %c0_i32 : i32, i32, i32
  }
  func.func @transform_8(%arg0: i32, %arg1: i32) -> (i32, i32, i32) {
    %c0_i32 = arith.constant 0 : i32
    %c0_i32_0 = arith.constant 0 : i32
    return %arg0, %arg1, %c0_i32 : i32, i32, i32
  }
}

</mosaic_0001>

<bundles_post_ra>
// kernel: tpu_custom_call.1
= control target key start
LH: loop header
LB: loop body
LE: loop exit
PB: predicated region body
PF: predicated region fallthrough
CT: control target
= control target key end

     0   :  { %s2047_s0 = inlined_call_operand.hbm [shape: f32[2,16,32], index: 0, kind: input, shape index: {}]   ;;  %s2048_s1 = inlined_call_operand.hbm [shape: f32[2,16,32], index: 1, kind: input, shape index: {}]   ;;  %s2049_s2 = inlined_call_operand.hbm [shape: f32[2,16,32], index: 2, kind: input, shape index: {}]   ;;  %s2050_s3 = inlined_call_operand.hbm [shape: bf16[32,128], index: 3, kind: input, shape index: {}]   ;;  %s2051_s4 = inlined_call_operand.hbm [shape: bf16[32,128], index: 4, kind: input, shape index: {}]   ;;  %s2052_s5 = inlined_call_operand.vmem [shape: bf16[32,128], index: 5, kind: input, shape index: {}]   ;;  %s2053_s6 = inlined_call_operand.hbm [shape: bf16[2,16,128], index: 6, kind: output, shape index: {0}]   ;;  %s2054_s7 = inlined_call_operand.hbm [shape: bf16[2,16,128], index: 7, kind: output, shape index: {1}]   ;;  %s2055_s8 = inlined_call_operand.hbm [shape: bf16[2,16,128], index: 8, kind: output, shape index: {2}]  }
   0x1   :  { %2082 = sst [smem:[#allocation26_spill]] %s2048_s1 }
   0x2   :  { %2083 = sst [smem:[#allocation27_spill]] %s2050_s3 }
   0x3   :  { %2084 = sst [smem:[#allocation28_spill]] %s2055_s8 }
   0x4   :  { %14 = vsyncpa [#allocation3], 0 }
   0x5   :  { %16 = vsyncpa [#allocation3 + $0x1], 0 }
   0x6   :  { %17 = vsyncpa [#allocation6], 0 }
   0x7   :  { %19 = vsyncpa [#allocation6 + $0x1], 0 }
   0x8   :  { %20 = vsyncpa [#allocation9], 0 }
   0x9   :  { %21 = vsyncpa [#allocation4], 0 }
   0xa   :  { %23 = vsyncpa [#allocation4 + $0x1], 0 }
   0xb   :  { %24 = vsyncpa [#allocation13], 0 }
   0xc   :  { %26 = vsyncpa [#allocation13 + $0x1], 0  ;;  %s1577_s27 = smov 0   ;;  %s1579_s28 = smov 0  }
   0xd   :  { %s1581_s29 = smov 0   ;;  %s1583_s30 = smov 0  }
   0xe   :  { %s1585_s9 = smov 0   ;;  %s1587_s10 = smov 0  }
   0xf LB: > { %2085 = sst [smem:[#allocation20_spill]] %s1494_s27  ;;  %s1608_s11 = sadd.s32 4294967295, %s1514_s10   ;;  %s1514_s10 = sphi %s1587_s10, %s32_s10   ;;  %s1510_s9 = sphi %s1585_s9, %s2127_s9   ;;  %s1506_s30 = sphi %s1583_s30, %s2126_s30   ;;  %s1502_s29 = sphi %s1581_s29, %s2130_s29   ;;  %s1498_s28 = sphi %s1579_s28, %s2129_s28   ;;  %s1494_s27 = sphi %s1577_s27, %s2128_s27  }
  0x10   : > { %2086 = sst [smem:[#allocation21_spill]] %s1510_s9  ;;  %s2056_s12 = sadd.s32 4294967294, %s1514_s10  }
  0x11   : > { %2087 = sst [smem:[#allocation22_spill]] %s1514_s10  ;;  %p60_p0 = scmp.ne.s32.totalorder %s1502_s29, %s1498_s28 }
  0x12   : > { %p61_p1 = scmp.eq.s32.totalorder %s1514_s10, 0  ;;  %p66_p2 = scmp.ne.s32.totalorder %s1498_s28, %s1494_s27 }
  0x13   : > { %p2058_p3 = scmp.eq.s32.totalorder %s1608_s11, 0  ;;  %p211_p5 = scmp.eq.s32.totalorder %s1608_s11, 1 }
  0x14   : > { %p1617_p4 = por %p61_p1, %p60_p0  ;;  %p217_p7 = scmp.eq.s32.totalorder %s2056_s12, 1 }
  0x15   : > { %p1624_p6 = por %p2058_p3, %p66_p2  ;;  %p1630_p8 = por %p211_p5, %p60_p0 }
  0x16   : > { %p993_p9 = scmp.ge.s32.totalorder %s1514_s10, 1  ;;  %p1635_p10 = por %p217_p7, %p66_p2 }
  0x17   : > { %s2089_s14 = scalar_select %p1624_p6, 1, 0 }
  0x18   : > { %s2090_s15 = scalar_select %p1630_p8, 1, 0 }
  0x19   : > { %s2091_s16 = scalar_select %p1635_p10, 1, 0 }
  0x1a   : > { %p280_p11 = scmp.lt.s32.totalorder %s1514_s10, 3  ;;  %s1516_s18 = smov [#allocation8]  }
  0x1b   : > { %2092 = sst [smem:[#allocation23_spill]] %s2091_s16  ;;  %s292_s19 = sshll.u32 %s1516_s18, 4  ;;  %s1644_s19 = int_to_ptr.vmem [resolvable:$true] %s292_s19 }
  0x1c   : > { %p1640_p12 = pnand %p993_p9, %p280_p11  ;;  %s44_s21 = sadd.s32 1, %s1510_s9 }
  0x1d   : > { %p1657_p2 = scmp.ge.s32.totalorder %s44_s21, 2  ;;  %s2096_s3 = sld [smem:[#allocation27_spill]] }
  0x1e   : > { %s2093_s17 = scalar_select %p1640_p12, 1, 0 }
  0x1f   : > { %p1121_p13 = pneg %p1640_p12 }
  0x21   : > { %p1651_p1 = pnand %p1121_p13, %p2058_p3 }
  0x23   : > { %s2094_s20 = scalar_select %p1651_p1, 1, 0 }
  0x24   : > { %s1218_s26 = scalar_lea.hbm %s2096_s3, 256  ;;  %p2069_p7 = pneg %p1651_p1 }
  0x25   : > { %p1219_p5 = scmp.ne.s32.totalorder %s2096_s3, %s1218_s26  ;;  %p1225_p13 = scmp.lt.u32.totalorder %s1218_s26, %s2096_s3 }
  0x27   : > { %p1221_p9 = pnand %p2069_p7, %p1219_p5 }
  0x29   : > { %p1222_p11 = pneg %p1221_p9 }
  0x2b   : > { %p1227_p0 = pnand %p1225_p13, %p1222_p11 }
  0x2d   : > { %1230 = shalt.err (!%p1227_p0)
}
  0x2e   : > { %s1231_s24 = scalar_lea.vmem %s1644_s19, 256  ;;  %p1239_p6 = scmp.lt.s32.totalorder %s1644_s19, %s1644_s19 }
  0x2f   : > { %p1232_p3 = scmp.ne.s32.totalorder %s1644_s19, %s1231_s24  ;;  %p1240_p5 = scmp.lt.s32.totalorder %s1231_s24, %s1231_s24 }
  0x31   : > { %p1234_p10 = pnand %p1232_p3, %p2069_p7  ;;  %p1241_p9 = por %p1240_p5, %p1239_p6 }
  0x33   : > { %p1235_p8 = pneg %p1234_p10 }
  0x35   : > { %p1242_p12 = pnand %p1241_p9, %p1235_p8 }
  0x37   : > { %1245 = shalt.err (!%p1242_p12)
}
  0x38   : > { %s2064_s12 = smov 64   ;;  %s2066_s16 = smov 4  }
  0x39   : > { %1124 = dma.hbm_to_vmem [thread:$0]  (!%p1651_p1), %s2096_s3, 256, %s1644_s19, [#allocation9], %s2064_s12, %s2064_s12, %s2066_s16  }
  0x3a   : > { %s2132_s21 = smov (%p1657_p2, %s44_s21), 0  ;;  %p1150_p3 = scmp.lt.s32.totalorder %s1514_s10, 2 }
  0x3b   : > { %2097 = sst [smem:[#allocation24_spill]] %s2132_s21  ;;  %s2065_s26 = sand.u32 1, %s1502_s29  }
  0x3c   : > { %s48_s18 = ssub.s32 %s1510_s9, %s2132_s21  ;;  %s1701_s24 = sshll.u32 %s2065_s26, 4 }
  0x3d   : > { %p51_p6 = scmp.eq.s32.totalorder %s48_s18, 0  ;;  %s1704_s27 = sshll.u32 %s1510_s9, 8 }
  0x3e   : > { %p1708_p8 = pnand %p1150_p3, %p1617_p4  ;;  %s2099_s19 = sadd.s32 1, %s1502_s29 }
  0x3f   : > { %s1715_s23 = scalar_select %p51_p6, %s1502_s29, %s2099_s19  }
  0x40   : > { %s2098_s8 = scalar_select %p1708_p8, 1, 0 }
  0x41   : > { %2100 = sst [smem:[#allocation25_spill]] %s1715_s23  ;;  %s345_s22 = sand.u32 1, %s1514_s10  }
  0x42   : > { %s2101_s1 = sld [smem:[#allocation26_spill]]  ;;  %s349_s13 = scalar_lea.vmem [#allocation5], %s1701_s24 }
  0x43   : > { %s358_s18 = sshll.u32 %s349_s13, 4  ;;  %s1519_s16 = smov [#allocation10]   ;;  %s1725_s18 = int_to_ptr.vmem [resolvable:$true] %s358_s18 }
  0x44   : > { %s1727_s3 = sshll.u32 %s1519_s16, 4  ;;  %s1729_s21 = scalar_lea.sflag [#allocation6], %s345_s22  ;;  %s306_s3 = int_to_ptr.vmem [resolvable:$true] %s1727_s3 }
  0x45   : > { %p1735_p10 = pneg %p1708_p8 }
  0x47   : > { %s2102_s12 = scalar_select %p1735_p10, 1, 0 }
  0x48   : > { %s1722_s26 = scalar_lea.hbm %s2101_s1, %s1704_s27  ;;  %s1251_s9 = scalar_lea.hbm %s2101_s1, 512 }
  0x49   : > { %s1246_s19 = scalar_lea.hbm %s1722_s26, 256  ;;  %p1252_p2 = scmp.lt.u32.totalorder %s1722_s26, %s2101_s1 }
  0x4a   : > { %p1247_p4 = scmp.ne.s32.totalorder %s1722_s26, %s1246_s19  ;;  %p1253_p11 = scmp.lt.u32.totalorder %s1251_s9, %s1246_s19 }
  0x4b   : > { %p1255_p5 = scmp.lt.u32.totalorder %s1246_s19, %s1722_s26 }
  0x4c   : > { %p1249_p12 = pnand %p1735_p10, %p1247_p4  ;;  %p1254_p13 = por %p1253_p11, %p1252_p2 }
  0x4e   : > { %p1250_p0 = pneg %p1249_p12  ;;  %p1256_p9 = por %p1255_p5, %p1254_p13 }
  0x50   : > { %p1257_p3 = pnand %p1256_p9, %p1250_p0 }
  0x52   : > { %1260 = shalt.err (!%p1257_p3)
}
  0x53   : > { %s1261_s22 = scalar_lea.vmem %s1725_s18, 256  ;;  %s1520_s25 = smov [#allocation5]  }
  0x54   : > { %p1262_p6 = scmp.ne.s32.totalorder %s1725_s18, %s1261_s22  ;;  %s1266_s13 = sshll.u32 %s1520_s25, 4  ;;  %s1267_s13 = int_to_ptr.vmem [resolvable:$false] %s1266_s13 }
  0x55   : > { %s1268_s23 = scalar_lea.vmem %s1267_s13, 512  ;;  %p1269_p7 = scmp.lt.s32.totalorder %s1725_s18, %s1267_s13 }
  0x56   : > { %p1264_p4 = pnand %p1262_p6, %p1735_p10  ;;  %p1270_p1 = scmp.lt.s32.totalorder %s1268_s23, %s1261_s22 }
  0x58   : > { %p1265_p12 = pneg %p1264_p4  ;;  %p1271_p2 = por %p1270_p1, %p1269_p7 }
  0x5a   : > { %p1272_p11 = pnand %p1271_p2, %p1265_p12 }
  0x5c   : > { %1275 = shalt.err (!%p1272_p11)
}
  0x5d   : > { %s2078_s9 = smov 128   ;;  %s2080_s19 = smov 8  }
  0x5e   : > { %1134 = dma.hbm_to_vmem [thread:$0]  (!%p1708_p8), %s1722_s26, 256, %s1725_s18, %s1729_s21, %s2078_s9, %s2078_s9, %s2080_s19  }
  0x5f   : > { %s1276_s22 = scalar_lea.hbm %s2051_s4, 256  ;;  %p2103_p7 = scmp.ne.s32.totalorder %s2094_s20, 0 }
  0x60   : > { %p1277_p1 = scmp.ne.s32.totalorder %s2051_s4, %s1276_s22  ;;  %p1283_p9 = scmp.lt.u32.totalorder %s1276_s22, %s2051_s4 }
  0x61   : > { %p2104_p0 = pneg %p2103_p7 }
  0x63   : > { %p1279_p13 = pnand %p1277_p1, %p2104_p0 }
  0x65   : > { %p1280_p5 = pneg %p1279_p13 }
  0x67   : > { %p1285_p3 = pnand %p1283_p9, %p1280_p5 }
  0x69   : > { %1288 = shalt.err (!%p1285_p3)
}
  0x6a   : > { %s1289_s26 = scalar_lea.vmem %s306_s3, 256  ;;  %p2105_p4 = pmov %p2104_p0 }
  0x6b   : > { %p1290_p6 = scmp.ne.s32.totalorder %s306_s3, %s1289_s26  ;;  %p1297_p11 = scmp.lt.s32.totalorder %s306_s3, %s306_s3 }
  0x6c   : > { %p1298_p8 = scmp.lt.s32.totalorder %s1289_s26, %s1289_s26 }
  0x6d   : > { %p1292_p12 = pnand %p1290_p6, %p2105_p4 }
  0x6e   : > { %p1299_p10 = por %p1298_p8, %p1297_p11 }
  0x6f   : > { %p1293_p2 = pneg %p1292_p12 }
  0x71   : > { %p1300_p0 = pnand %p1299_p10, %p1293_p2 }
  0x73   : > { %1303 = shalt.err (!%p1300_p0)
}
  0x74   : > { %s2106_s18 = smov 4   ;;  %s2107_s16 = smov 64  }
  0x75   : > { %1127 = dma.hbm_to_vmem [thread:$0]  (!%p2103_p7), %s2051_s4, 256, %s306_s3, [#allocation9], %s2107_s16, %s2107_s16, %s2106_s18  }
  0x76   : > { %s1790_s13 = scalar_lea.hbm %s2047_s0, %s1704_s27  ;;  %s326_s20 = scalar_lea.vmem [#allocation2], %s1701_s24 }
  0x77   : > { %s335_s23 = sshll.u32 %s326_s20, 4  ;;  %s1799_s10 = scalar_lea.hbm %s2049_s2, %s1704_s27  ;;  %s1793_s23 = int_to_ptr.vmem [resolvable:$true] %s335_s23 }
  0x78   : > { %s2108_s9 = sand.u32 1, %s1502_s29   ;;  %s1304_s18 = scalar_lea.hbm %s1790_s13, 256 }
  0x79   : > { %s1803_s3 = scalar_lea.sflag [#allocation3], %s2108_s9  ;;  %p1305_p8 = scmp.ne.s32.totalorder %s1790_s13, %s1304_s18 }
  0x7a   : > { %p2109_p10 = scmp.ne.s32.totalorder %s2102_s12, 0  ;;  %s1309_s22 = scalar_lea.hbm %s2047_s0, 512 }
  0x7b   : > { %p1310_p13 = scmp.lt.u32.totalorder %s1790_s13, %s2047_s0  ;;  %p1311_p5 = scmp.lt.u32.totalorder %s1309_s22, %s1304_s18 }
  0x7c   : > { %p1307_p1 = pnand %p1305_p8, %p2109_p10  ;;  %p1313_p3 = scmp.lt.u32.totalorder %s1304_s18, %s1790_s13 }
  0x7d   : > { %p1312_p9 = por %p1311_p5, %p1310_p13 }
  0x7e   : > { %p1308_p7 = pneg %p1307_p1 }
  0x7f   : > { %p1314_p6 = por %p1313_p3, %p1312_p9 }
  0x81   : > { %p1315_p4 = pnand %p1314_p6, %p1308_p7 }
  0x83   : > { %1318 = shalt.err (!%p1315_p4)
}
  0x84   : > { %s1319_s27 = scalar_lea.vmem %s1793_s23, 256  ;;  %s1523_s9 = smov [#allocation2]  }
  0x85   : > { %p1320_p12 = scmp.ne.s32.totalorder %s1793_s23, %s1319_s27  ;;  %s1324_s26 = sshll.u32 %s1523_s9, 4  ;;  %s1325_s26 = int_to_ptr.vmem [resolvable:$false] %s1324_s26 }
  0x86   : > { %s1326_s19 = scalar_lea.vmem %s1325_s26, 512  ;;  %p1327_p0 = scmp.lt.s32.totalorder %s1793_s23, %s1325_s26 }
  0x87   : > { %p1322_p2 = pnand %p1320_p12, %p2109_p10  ;;  %p1328_p8 = scmp.lt.s32.totalorder %s1326_s19, %s1319_s27 }
  0x89   : > { %p1323_p11 = pneg %p1322_p2  ;;  %p1329_p1 = por %p1328_p8, %p1327_p0 }
  0x8b   : > { %p1330_p13 = pnand %p1329_p1, %p1323_p11 }
  0x8d   : > { %1333 = shalt.err (!%p1330_p13)
}
  0x8e   : > { %p2110_p7 = scmp.ne.s32.totalorder %s2098_s8, 0  ;;  %s2111_s1 = smov 8  }
  0x8f   : > { %s2112_s18 = smov 128   ;;  %s372_s16 = scalar_lea.vmem [#allocation7], %s1701_s24 }
  0x90   : > { %1131 = dma.hbm_to_vmem [thread:$0]  (!%p2110_p7), %s1790_s13, 256, %s1793_s23, %s1803_s3, %s2112_s18, %s2112_s18, %s2111_s1  }
  0x91   : > { %s381_s25 = sshll.u32 %s372_s16, 4  ;;  %s1334_s22 = scalar_lea.hbm %s1799_s10, 256  ;;  %s1831_s25 = int_to_ptr.vmem [resolvable:$true] %s381_s25 }
  0x92   : > { %p1335_p5 = scmp.ne.s32.totalorder %s1799_s10, %s1334_s22  ;;  %s1339_s9 = scalar_lea.hbm %s2049_s2, 512 }
  0x93   : > { %p1340_p6 = scmp.lt.u32.totalorder %s1799_s10, %s2049_s2  ;;  %p1341_p4 = scmp.lt.u32.totalorder %s1339_s9, %s1334_s22 }
  0x94   : > { %p1337_p9 = pnand %p1335_p5, %p2109_p10  ;;  %p1343_p2 = scmp.lt.u32.totalorder %s1334_s22, %s1799_s10 }
  0x95   : > { %p1342_p12 = por %p1341_p4, %p1340_p6 }
  0x96   : > { %p1338_p3 = pneg %p1337_p9 }
  0x97   : > { %p1344_p11 = por %p1343_p2, %p1342_p12 }
  0x99   : > { %p1345_p0 = pnand %p1344_p11, %p1338_p3 }
  0x9b   : > { %1348 = shalt.err (!%p1345_p0)
}
  0x9c   : > { %s1349_s24 = scalar_lea.vmem %s1831_s25, 256  ;;  %s1524_s13 = smov [#allocation7]  }
  0x9d   : > { %p1350_p8 = scmp.ne.s32.totalorder %s1831_s25, %s1349_s24  ;;  %s1354_s23 = sshll.u32 %s1524_s13, 4  ;;  %s1355_s23 = int_to_ptr.vmem [resolvable:$false] %s1354_s23 }
  0x9e   : > { %s1356_s3 = scalar_lea.vmem %s1355_s23, 512  ;;  %p1357_p5 = scmp.lt.s32.totalorder %s1831_s25, %s1355_s23 }
  0x9f   : > { %p1352_p1 = pnand %p1350_p8, %p2109_p10  ;;  %p1358_p9 = scmp.lt.s32.totalorder %s1356_s3, %s1349_s24 }
  0xa1   : > { %p1353_p13 = pneg %p1352_p1  ;;  %p1359_p6 = por %p1358_p9, %p1357_p5 }
  0xa3   : > { %p1360_p4 = pnand %p1359_p6, %p1353_p13 }
  0xa5   : > { %1363 = shalt.err (!%p1360_p4)
}
  0xa6   : > { %1137 = dma.hbm_to_vmem [thread:$0]  (!%p2110_p7), %s1799_s10, 256, %s1831_s25, %s1729_s21, %s2112_s18, %s2112_s18, %s2111_s1  }
  0xa7   : > { %p2113_p10 = scmp.ne.s32.totalorder %s2093_s17, 0 }
  0xa8   : > { %s1861_s12 = sand.u32 (!%p2113_p10), 1, %s1498_s28   ;;  %p2114_p3 = scmp.ne.s32.totalorder (!%p2113_p10), %s2089_s14, 0 }
  0xa9   : > { %393 = sbr.rel (%p2113_p10) target bundleno = 473 (0x1d9), region = 44  ;;  %s1864_s16 = sshll.u32 (!%p2113_p10), %s1861_s12, 4 }
  0xaa   : > { %s396_s8 = scalar_lea.sflag (!%p2113_p10), [#allocation3], %s1861_s12  ;;  %s399_s22 = scalar_lea.vmem (!%p2113_p10), [#allocation2], %s1864_s16 }
  0xb0   : > { %1473 = dma.done.wait (%p2114_p3), %s396_s8, 256  }
  0xb1   : > { %1475 = vsyncadd (%p2114_p3), %s396_s8, 4294967040  ;;  %s404_s17 = sand.u32 1, %s1608_s11   ;;  %s408_s10 = scalar_lea.vmem [#allocation5], %s1864_s16 }
  0xb2   : > { %s405_s21 = scalar_lea.sflag [#allocation6], %s404_s17 }
  0xb3   : > { %1477 = dma.done.wait (%p2114_p3), %s405_s21, 512  }
  0xb4   : > { %1479 = vsyncadd (%p2114_p3), %s405_s21, 4294966784  ;;  %s417_s1 = scalar_lea.vmem [#allocation7], %s1864_s16  ;;  %p2115_p7 = scmp.eq.s32.totalorder %s1608_s11, 0 }
  0xb6   : > { %1481 = dma.done.wait (%p2115_p7), [#allocation9], 512   ;;  %p2116_p12 = pmov %p2115_p7 }
  0xb7   : > { %v1525_v0 = vmov 0.0   ;;  %vm1526_vm0 = vmmov 0   ;;  %v1212_v1 = vld [vmem:[#allocation8] sm:$0xff]   ;;  %v1213_v2 = vld [vmem:[#allocation8 + $0x8] sm:$0xff]   ;;  %v1214_v3 = vld [vmem:[#allocation10] sm:$0xff]   ;;  %vm510_vm1 = vcmask 261120  }
  0xb8   : > { %1483 = vsyncadd (%p2116_p12), [#allocation9], 4294966784  ;;  %1077 = vmatprep.subr.bf16.mxu0 %v1525_v0  ;;  %1085 = vmatprep.subr.bf16.mxu1 %v1525_v0  ;;  %v485_v4 = vld [vmem:[%s399_s22] sm:$0xff]  ;;  %v486_v5 = vld [vmem:[%s399_s22 + $0x8] sm:$0xff]  ;;  %s1899_s27 = sshll.u32 %s1861_s12, 3  ;;  %s1906_s13 = sshll.u32 %s1506_s30, 7 }
  0xb9   : > { %1081 = vmatprep.mubr.msk.bf16.mxu0 %vm1526_vm0, %v1525_v0  ;;  %1089 = vmatprep.mubr.msk.bf16.mxu1 %vm1526_vm0, %v1525_v0  ;;  %v1215_v6 = vld [vmem:[%s2052_s5] sm:$0xff]   ;;  %v487_v7 = vpack.c.bf16 %v486_v5, %v485_v4  ;;  %v1216_v8 = vld [vmem:[#allocation10 + $0x8] sm:$0xff]   ;;  %v1217_v12 = vld [vmem:[%s2052_s5 + $0x8] sm:$0xff]   ;;  %s463_s9 = scalar_lea.vmem [#allocation11], %s1899_s27  ;;  %s470_s19 = scalar_lea.vmem [#allocation12], %s1899_s27 }
  0xba   : > { %1078 = vmatpush3.bf16.msra.mxu0 %v1212_v1  ;;  %1086 = vmatpush3.bf16.msra.mxu1 %v1214_v3  ;;  %v488_v9 = vld [vmem:[%s408_s10] sm:$0xff]  ;;  %v489_v10 = vld [vmem:[%s408_s10 + $0x8] sm:$0xff]  ;;  %s733_s26 = sshll.u32 %s463_s9, 4  ;;  %s751_s24 = sshll.u32 %s470_s19, 4  ;;  %s1903_s26 = int_to_ptr.vmem [resolvable:$true] %s733_s26  ;;  %s1908_s24 = int_to_ptr.vmem [resolvable:$true] %s751_s24 }
  0xbb   : > { %1079 = vmatprep.subr.bf16.mxu0 %v1525_v0  ;;  %1087 = vmatprep.subr.bf16.mxu1 %v1525_v0  ;;  %v490_v11 = vpack.c.bf16 %v489_v10, %v488_v9  ;;  %v491_v13 = vld [vmem:[%s417_s1] sm:$0xff]  ;;  %v492_v14 = vld [vmem:[%s417_s1 + $0x8] sm:$0xff]  ;;  %s1914_s30 = scalar_lea.hbm %s2054_s7, %s1906_s13  ;;  %s1920_s22 = scalar_lea.hbm %s2053_s6, %s1906_s13 }
  0xbc   : > { %v493_v15 = vpack.c.bf16 %v492_v14, %v491_v13  ;;  %s477_s21 = scalar_lea.vmem [#allocation14], %s1899_s27  ;;  %s1931_s1 = scalar_lea.sflag [#allocation13], %s404_s17 }
  0xbd   : > { %s1925_s10 = sshll.u32 %s477_s21, 4  ;;  %s1364_s14 = scalar_lea.vmem %s1908_s24, 128  ;;  %s1987_s10 = int_to_ptr.vmem [resolvable:$true] %s1925_s10 }
  0xbe   : > { %1080 = vmatpush3.bf16.msra.mxu0 %v1213_v2  ;;  %1088 = vmatpush3.bf16.msra.mxu1 %v1216_v8  ;;  %p1365_p2 = scmp.ne.s32.totalorder %s1908_s24, %s1364_s14  ;;  %p2117_p11 = scmp.ne.s32.totalorder %s2090_s15, 0 }
  0xbf   : > { %1093 = vmatprep.subr.bf16.mxu0 %v1525_v0  ;;  %s1527_s18 = smov [#allocation12]  }
  0xc0   : > { %p1366_p0 = pnand %p1365_p2, %p2117_p11  ;;  %s1368_s25 = sshll.u32 %s1527_s18, 4  ;;  %s1369_s25 = int_to_ptr.vmem [resolvable:$false] %s1368_s25 }
  0xc1   : > { %1082 = vmatmul.mubr.msk.bf16.vlgmr.msra.gmra.mrb[0].mxu0 %vm510_vm1, %v487_v7  ;;  %1090 = vmatmul.mubr.msk.bf16.vlgmr.msra.gmra.mrb[0].mxu1 %vm510_vm1, %v490_v11  ;;  %s1370_s20 = scalar_lea.vmem %s1369_s25, 256  ;;  %p1371_p1 = scmp.lt.s32.totalorder %s1908_s24, %s1369_s25 }
  0xc2   : > { %1094 = vmatpush3.bf16.msra.mxu0 %v1215_v6  ;;  %1097 = vmatprep.mubr.msk.bf16.mxu0 %vm1526_vm0, %v1525_v0  ;;  %p1367_p8 = pneg %p1366_p0  ;;  %p1372_p13 = scmp.lt.s32.totalorder %s1370_s20, %s1364_s14 }
  0xc3   : > { %1095 = vmatprep.subr.bf16.mxu0 %v1525_v0 }
  0xc4   : > { %p1373_p5 = por %p1372_p13, %p1371_p1 }
  0xc6   : > { %1096 = vmatpush3.bf16.msra.mxu0 %v1217_v12  ;;  %p1374_p9 = pnand %p1373_p5, %p1367_p8 }
  0xc9   : > { %1098 = vmatmul.mubr.msk.bf16.vlgmr.msra.gmra.mrb[4].mxu0 %vm510_vm1, %v493_v15 }
 0x194   : > { %v548_v16 = vpop.f32.mrb[0].mxu0  ;;  %v620_v19 = vpop.f32.mrb[0].mxu1 }
 0x195   : > { %v1083_v17 = vpop.f32.mrb[1].mxu0  ;;  %v555_v20 = vmul.f32 0.25, %v548_v16  ;;  %v1091_v23 = vpop.f32.mrb[1].mxu1 }
 0x196   : > { %v551_v18 = vpop.f32.mrb[2].mxu0  ;;  %v623_v24 = vpop.f32.mrb[2].mxu1 }
 0x197   : > { %v556_v21 = vmul.f32 0.25, %v551_v18  ;;  %v1084_v22 = vpop.f32.mrb[3].mxu0  ;;  %v1061_v26 = vpack.c.bf16 %v623_v24, %v620_v19  ;;  %v1092_v27 = vpop.f32.mrb[3].mxu1 }
 0x199   : > { %v1056_v25 = vpack.c.bf16 %v556_v21, %v555_v20  ;;  %1062 = vst [vmem:[%s470_s19] sm:$0xff] %v1061_v26  }
 0x19b   : > { %1057 = vst [vmem:[%s463_s9] sm:$0xff] %v1056_v25  }
 0x19c   : > { %v1927_v28 = vpop.f32.mrb[4].mxu0 }
 0x19d   : > { %1377 = shalt.err (!%p1374_p9)
}
 0x19e   : > { %s1378_s11 = scalar_lea.hbm %s1914_s30, 128  ;;  %s1382_s19 = scalar_lea.hbm %s2054_s7, 256 }
 0x19f   : > { %p1379_p6 = scmp.ne.s32.totalorder %s1914_s30, %s1378_s11  ;;  %p1383_p3 = scmp.lt.u32.totalorder %s1914_s30, %s2054_s7 }
 0x1a0   : > { %p1384_p7 = scmp.lt.u32.totalorder %s1382_s19, %s1378_s11  ;;  %p1386_p2 = scmp.lt.u32.totalorder %s1378_s11, %s1914_s30 }
 0x1a1   : > { %p1380_p4 = pnand %p1379_p6, %p2117_p11 }
 0x1a2   : > { %p1385_p12 = por %p1384_p7, %p1383_p3 }
 0x1a3   : > { %p1381_p10 = pneg %p1380_p4 }
 0x1a4   : > { %p1387_p0 = por %p1386_p2, %p1385_p12 }
 0x1a6   : > { %p1388_p8 = pnand %p1387_p0, %p1381_p10 }
 0x1a8   : > { %1391 = shalt.err (!%p1388_p8)
}
 0x1a9   : > { %s1528_s16 = smov 64   ;;  %s1529_s8 = smov 4   ;;  %v1099_v29 = vpop.f32.mrb[5].mxu0 }
 0x1aa   : > { %1116 = dma.vmem_to_hbm [thread:$0]  (%p2117_p11), %s1908_s24, 128, %s1914_s30, %s1931_s1, %s1528_s16, %s1528_s16, %s1529_s8  }
 0x1ab   : > { %s708_s14 = scalar_lea.sflag [#allocation4], %s1861_s12  ;;  %s1392_s18 = scalar_lea.vmem %s1903_s26, 128 }
 0x1ac   : > { %p1393_p1 = scmp.ne.s32.totalorder %s1903_s26, %s1392_s18  ;;  %s1530_s25 = smov [#allocation11]  }
 0x1ad   : > { %s1396_s20 = sshll.u32 %s1530_s25, 4  ;;  %s1397_s20 = int_to_ptr.vmem [resolvable:$false] %s1396_s20 }
 0x1ae   : > { %p1394_p13 = pnand %p1393_p1, %p2117_p11  ;;  %s1398_s11 = scalar_lea.vmem %s1397_s20, 256 }
 0x1af   : > { %p1399_p9 = scmp.lt.s32.totalorder %s1903_s26, %s1397_s20  ;;  %p1400_p6 = scmp.lt.s32.totalorder %s1398_s11, %s1392_s18 }
 0x1b0   : > { %p1395_p5 = pneg %p1394_p13 }
 0x1b1   : > { %p1401_p4 = por %p1400_p6, %p1399_p9 }
 0x1b3   : > { %p1402_p10 = pnand %p1401_p4, %p1395_p5 }
 0x1b5   : > { %1405 = shalt.err (!%p1402_p10)
}
 0x1b6   : > { %s1406_s24 = scalar_lea.hbm %s1920_s22, 128  ;;  %s1410_s9 = scalar_lea.hbm %s2053_s6, 256 }
 0x1b7   : > { %p1407_p3 = scmp.ne.s32.totalorder %s1920_s22, %s1406_s24  ;;  %p1411_p2 = scmp.lt.u32.totalorder %s1920_s22, %s2053_s6 }
 0x1b8   : > { %p1412_p0 = scmp.lt.u32.totalorder %s1410_s9, %s1406_s24  ;;  %p1414_p1 = scmp.lt.u32.totalorder %s1406_s24, %s1920_s22 }
 0x1b9   : > { %p1408_p7 = pnand %p1407_p3, %p2117_p11 }
 0x1ba   : > { %p1413_p8 = por %p1412_p0, %p1411_p2 }
 0x1bb   : > { %p1409_p12 = pneg %p1408_p7 }
 0x1bc   : > { %p1415_p13 = por %p1414_p1, %p1413_p8 }
 0x1be   : > { %p1416_p5 = pnand %p1415_p13, %p1409_p12 }
 0x1c0   : > { %1419 = shalt.err (!%p1416_p5)
}
 0x1c1   : > { %1115 = dma.vmem_to_hbm [thread:$0]  (%p2117_p11), %s1903_s26, 128, %s1920_s22, %s708_s14, %s1528_s16, %s1528_s16, %s1529_s8   ;;  %v693_v30 = vpop.f32.mrb[6].mxu0 }
 0x1c2   : > { %v1066_v31 = vpack.c.bf16 %v693_v30, %v1927_v28  ;;  %v1100_v32 = vpop.f32.mrb[7].mxu0  ;;  %s2118_s25 = sld [smem:[#allocation28_spill]]  ;;  %s1420_s20 = scalar_lea.vmem %s1987_s10, 128 }
 0x1c3   : > { %p1421_p9 = scmp.ne.s32.totalorder %s1987_s10, %s1420_s20  ;;  %s1531_s26 = smov [#allocation14]  }
 0x1c4   : > { %1067 = vst [vmem:[%s477_s21] sm:$0xff] %v1066_v31   ;;  %s1424_s22 = sshll.u32 %s1531_s26, 4  ;;  %s1425_s22 = int_to_ptr.vmem [resolvable:$false] %s1424_s22 }
 0x1c5   : > { %p1422_p6 = pnand %p1421_p9, %p2117_p11  ;;  %s1426_s14 = scalar_lea.vmem %s1425_s22, 256 }
 0x1c6   : > { %p1427_p10 = scmp.lt.s32.totalorder %s1987_s10, %s1425_s22  ;;  %p1428_p3 = scmp.lt.s32.totalorder %s1426_s14, %s1420_s20 }
 0x1c7   : > { %p1423_p4 = pneg %p1422_p6 }
 0x1c8   : > { %s1993_s12 = scalar_lea.hbm %s2118_s25, %s1906_s13  ;;  %p1429_p7 = por %p1428_p3, %p1427_p10 }
 0x1ca   : > { %p1430_p12 = pnand %p1429_p7, %p1423_p4 }
 0x1cc   : > { %1433 = shalt.err (!%p1430_p12)
}
 0x1cd   : > { %s1434_s27 = scalar_lea.hbm %s1993_s12, 128  ;;  %s1438_s11 = scalar_lea.hbm %s2118_s25, 256 }
 0x1ce   : > { %p1435_p2 = scmp.ne.s32.totalorder %s1993_s12, %s1434_s27  ;;  %p1439_p1 = scmp.lt.u32.totalorder %s1993_s12, %s2118_s25 }
 0x1cf   : > { %p1440_p13 = scmp.lt.u32.totalorder %s1438_s11, %s1434_s27  ;;  %p1442_p9 = scmp.lt.u32.totalorder %s1434_s27, %s1993_s12 }
 0x1d0   : > { %p1436_p0 = pnand %p1435_p2, %p2117_p11 }
 0x1d1   : > { %p1441_p5 = por %p1440_p13, %p1439_p1 }
 0x1d2   : > { %p1437_p8 = pneg %p1436_p0 }
 0x1d3   : > { %p1443_p6 = por %p1442_p9, %p1441_p5 }
 0x1d5   : > { %p1444_p4 = pnand %p1443_p6, %p1437_p8 }
 0x1d7   : > { %1447 = shalt.err (!%p1444_p4)
}
 0x1d8   : > { %1117 = dma.vmem_to_hbm [thread:$0]  (%p2117_p11), %s1987_s10, 128, %s1993_s12, %s1931_s1, %s1528_s16, %s1528_s16, %s1529_s8  }
 0x1d9 PF: > { %s2119_s17 = sld [smem:[#allocation20_spill]]  ;;  %s2120_s9 = sld [smem:[#allocation23_spill]] }
 0x1da   : > { %s2121_s19 = sld [smem:[#allocation22_spill]] }
 0x1df   : > { %s784_s23 = sand.u32 1, %s2119_s17   ;;  %p2122_p10 = scmp.ne.s32.totalorder %s2120_s9, 0 }
 0x1e0   : > { %p2123_p3 = scmp.ge.s32.totalorder %s2121_s19, 2  ;;  %s785_s3 = scalar_lea.sflag [#allocation4], %s784_s23 }
 0x1e2   : > { %p1139_p7 = pnand %p2123_p3, %p2122_p10 }
 0x1e4   : > { %1485 = dma.done.wait (!%p1139_p7), %s785_s3, 128  }
 0x1e5   : > { %1487 = vsyncadd (!%p1139_p7), %s785_s3, 4294967168  ;;  %s2124_s15 = sadd.s32 4294967294, %s2121_s19  }
 0x1e6   : > { %s793_s18 = sand.u32 1, %s2124_s15  }
 0x1e7   : > { %s794_s20 = scalar_lea.sflag [#allocation13], %s793_s18 }
 0x1e8   : > { %1489 = dma.done.wait (!%p1139_p7), %s794_s20, 256  }
 0x1e9   : > { %1491 = vsyncadd (!%p1139_p7), %s794_s20, 4294967040  ;;  %s32_s10 = sadd.s32 1, %s2121_s19   ;;  %s2125_s1 = sld [smem:[#allocation25_spill]] }
 0x1ea   : > { %p29_p11 = scmp.ge.s32.totalorder %s32_s10, 4   ;;  %s2126_s30 = sld [smem:[#allocation21_spill]] }
 0x1eb   : > { %s2127_s9 = sld [smem:[#allocation24_spill]]  ;;  %s2128_s27 = smov %s1498_s28 }
 0x1ec   : > { %s2129_s28 = smov %s1502_s29  ;;  %31 = sbr.rel (!%p29_p11) target bundleno = 15 (0xf), region = 153 }
 0x1ef   : > { %s2130_s29 = smov %s2125_s1 }
 0x1f3   :  { %808 = vsyncpa [#allocation3], 1 }
 0x1f4   :  { %810 = vsyncpa [#allocation3 + $0x1], 1 }
 0x1f5   :  { %811 = vsyncpa [#allocation6], 1 }
 0x1f6   :  { %813 = vsyncpa [#allocation6 + $0x1], 1 }
 0x1f7   :  { %814 = vsyncpa [#allocation9], 1 }
 0x1f8   :  { %815 = vsyncpa [#allocation4], 1 }
 0x1f9   :  { %817 = vsyncpa [#allocation4 + $0x1], 1 }
 0x1fa   :  { %818 = vsyncpa [#allocation13], 1 }
 0x1fb   :  { %820 = vsyncpa [#allocation13 + $0x1], 1 }

</bundles_post_ra>
